<compile_context>
chip_gen: v6e
topology: v6e:2x2x1
jax: 0.10.0
libtpu: 0.0.40
codegen_flags: <defaults>
</compile_context>

<pallas_src>
import functools

import jax
import jax.numpy as jnp
from jax.experimental import pallas as pl
from jax.experimental.pallas import tpu as pltpu

GAMMA = 2.0
EPS = 1e-10  # kept for documentation; adding a constant to every logit does not change softmax/CE


def _focal_loss_kernel(logits_ref, labels_ref, out_ref, acc_ref, *, n_valid):
    # logits_ref: (TILE_N, C) float in VMEM; labels_ref: (TILE_N, 1) int32 in VMEM
    # out_ref:    (1, 1) f32; acc_ref: (1, 1) f32 VMEM scratch (persists across grid)
    i = pl.program_id(0)

    @pl.when(i == 0)
    def _():
        acc_ref[...] = jnp.zeros_like(acc_ref)

    x = logits_ref[...].astype(jnp.float32)              # bf16 inputs upcast here
    labels = labels_ref[...]                              # (TILE_N, 1) int32; -1 marks padded rows
    tn, c = x.shape

    # numerically stable log-softmax -> per-row cross entropy
    m = jnp.max(x, axis=-1, keepdims=True)                                   # (TILE_N, 1)
    lse = m + jnp.log(jnp.sum(jnp.exp(x - m), axis=-1, keepdims=True))       # (TILE_N, 1)

    # target logit via lane-select (no one-hot materialize / multiply)
    col = jax.lax.broadcasted_iota(jnp.int32, (tn, c), 1)
    tgt = jnp.sum(jnp.where(col == labels, x, 0.0), axis=-1, keepdims=True)  # (TILE_N, 1)

    ce = lse - tgt                                                           # (TILE_N, 1)
    valid = (labels >= 0).astype(jnp.float32)                                # mask padded rows
    acc_ref[...] += jnp.sum(ce * valid, axis=0, keepdims=True)               # (1, 1)

    @pl.when(i == pl.num_programs(0) - 1)
    def _():
        L = acc_ref[...] / jnp.float32(n_valid)          # CE mean over the real batch
        p = jnp.exp(-L)
        q = 1.0 - p
        out_ref[...] = q * q * L                         # gamma == 2 -> two VPU multiplies


def focal_loss(y_pred, y_true, *, tile_n=None, vmem_budget_bytes=8 * 1024 * 1024):
    """y_pred: (N, C) float32/bfloat16 logits; y_true: (N,) integer class indices."""
    n, c = y_pred.shape
    n_rounded = ((n + 7) // 8) * 8

    if tile_n is None:
        # Biggest multiple-of-8 row tile whose double-buffered f32 footprint fits the budget.
        rows = vmem_budget_bytes // (2 * 4 * max(c, 1))
        tile_n = max(8, min(1024, (rows // 8) * 8))
    tile_n = max(8, (min(tile_n, n_rounded) // 8) * 8)

    n_pad = pl.cdiv(n, tile_n) * tile_n
    labels = y_true.astype(jnp.int32).reshape(n, 1)
    logits = y_pred
    if n_pad != n:
        logits = jnp.pad(logits, ((0, n_pad - n), (0, 0)))
        labels = jnp.pad(labels, ((0, n_pad - n), (0, 0)), constant_values=-1)

    n_tiles = n_pad // tile_n
    kernel = functools.partial(_focal_loss_kernel, n_valid=n)

    cost = pl.CostEstimate(
        flops=6 * n * c,
        transcendentals=n * c,
        bytes_accessed=int(logits.size * logits.dtype.itemsize + labels.size * 4 + 4),
    )

    out = pl.pallas_call(
        kernel,
        out_shape=jax.ShapeDtypeStruct((1, 1), jnp.float32),
        grid_spec=pltpu.PrefetchScalarGridSpec(
            num_scalar_prefetch=0,
            grid=(n_tiles,),
            in_specs=[
                # Full-C block on the lane axis (full-array-dim exception to the 128 rule);
                # rows tiled in multiples of 8 -> pipelined DMA over the batch.
                pl.BlockSpec((tile_n, c), lambda i: (i, 0)),
                pl.BlockSpec((tile_n, 1), lambda i: (i, 0)),
            ],
            out_specs=pl.BlockSpec((1, 1), lambda i: (0, 0)),   # resident across the reduction grid
            scratch_shapes=[pltpu.VMEM((1, 1), jnp.float32)],
        ),
        compiler_params=pltpu.CompilerParams(
            dimension_semantics=("arbitrary",),                 # batch axis is a reduction
        ),
        cost_estimate=cost,
    )(logits, labels)
    return out[0, 0]


def focal_loss_ref(y_pred, y_true):
    """Plain-JAX reference mirroring the PyTorch module."""
    x = y_pred.astype(jnp.float32) + EPS
    logz = jax.scipy.special.logsumexp(x, axis=-1)
    tgt = jnp.take_along_axis(x, y_true[:, None].astype(jnp.int32), axis=-1)[:, 0]
    L = jnp.mean(logz - tgt)
    p = jnp.exp(-L)
    return (1.0 - p) ** GAMMA * L


if __name__ == "__main__":
    key = jax.random.PRNGKey(0)
    k1, k2 = jax.random.split(key)

    # Small shape matching the module's forward (batch of logits + class indices).
    N, C = 8, 32
    y_pred = jax.random.normal(k1, (N, C), dtype=jnp.float32)
    y_true = jax.random.randint(k2, (N,), 0, C, dtype=jnp.int32)

    out = focal_loss(y_pred, y_true)
    jax.block_until_ready(out)
    ref = focal_loss_ref(y_pred, y_true)
    assert jnp.allclose(out, ref, rtol=1e-5, atol=1e-6), (out, ref)

    # Exercise the multi-tile accumulator + row-padding/masking path.
    N2, C2 = 300, 32
    y_pred2 = jax.random.normal(k1, (N2, C2), dtype=jnp.float32)
    y_true2 = jax.random.randint(k2, (N2,), 0, C2, dtype=jnp.int32)
    out2 = focal_loss(y_pred2, y_true2, tile_n=64)
    jax.block_until_ready(out2)
    ref2 = focal_loss_ref(y_pred2, y_true2)
    assert jnp.allclose(out2, ref2, rtol=1e-5, atol=1e-6), (out2, ref2)

    print("KERNEL_OK")
</pallas_src>

<mosaic_0001>
module attributes {stable_mosaic.version = 11 : i64} {
  func.func @_focal_loss_kernel(%arg0: i32, %arg1: memref<8x32xf32, #tpu.memory_space<vmem>>, %arg2: memref<8x1xi32, #tpu.memory_space<vmem>>, %arg3: memref<1x1xf32, #tpu.memory_space<vmem>>, %arg4: memref<1x1xf32, #tpu.memory_space<vmem>>) attributes {dimension_semantics = [#tpu.dimension_semantics<arbitrary>], iteration_bounds = array<i64: 1>, scalar_prefetch = 0 : i64, scratch_operands = 1 : i64, tpu.core_type = #tpu.core_type<tc>, window_params = [{transform_indices = @transform_0, window_bounds = array<i64: 8, 32>}, {transform_indices = @transform_1, window_bounds = array<i64: 8, 1>}, {pipeline_mode = #tpu.pipeline_mode<synchronous>, transform_indices = @transform_2, window_bounds = array<i64: 1, 1>}]} {
    %c0_i32 = arith.constant 0 : i32
    %0 = arith.cmpi eq, %arg0, %c0_i32 : i32
    %1 = arith.extui %0 : i1 to i32
    %c0_i32_0 = arith.constant 0 : i32
    %2 = arith.cmpi ne, %1, %c0_i32_0 : i32
    scf.if %2 {
      %cst_15 = arith.constant 0.000000e+00 : f32
      %35 = vector.broadcast %cst_15 : f32 to vector<1x1xf32>
      %c0_16 = arith.constant 0 : index
      %c0_17 = arith.constant 0 : index
      %36 = vector.load %arg4[%c0_16, %c0_17] : memref<1x1xf32, #tpu.memory_space<vmem>>, vector<1x1xf32>
      tpu.vector_store %arg4[%c0_16, %c0_17], %35 {strides = array<i32>} : memref<1x1xf32, #tpu.memory_space<vmem>>, vector<1x1xf32>,
    } else {
    }
    %c0 = arith.constant 0 : index
    %c0_1 = arith.constant 0 : index
    %3 = vector.load %arg1[%c0, %c0_1] : memref<8x32xf32, #tpu.memory_space<vmem>>, vector<8x32xf32>
    %c0_2 = arith.constant 0 : index
    %c0_3 = arith.constant 0 : index
    %4 = vector.load %arg2[%c0_2, %c0_3] : memref<8x1xi32, #tpu.memory_space<vmem>>, vector<8x1xi32>
    %cst = arith.constant dense<0xFF800000> : vector<8xf32>
    %5 = vector.multi_reduction <maximumf>, %3, %cst [1] : vector<8x32xf32> to vector<8xf32>
    %6 = vector.shape_cast %5 : vector<8xf32> to vector<8x1xf32>
    %7 = vector.broadcast %6 : vector<8x1xf32> to vector<8x32xf32>
    %8 = arith.subf %3, %7 : vector<8x32xf32>
    %9 = math.exp %8 : vector<8x32xf32>
    %cst_4 = arith.constant dense<0.000000e+00> : vector<8xf32>
    %10 = vector.multi_reduction <add>, %9, %cst_4 [1] : vector<8x32xf32> to vector<8xf32>
    %11 = vector.shape_cast %10 : vector<8xf32> to vector<8x1xf32>
    %12 = math.log %11 : vector<8x1xf32>
    %13 = arith.addf %6, %12 : vector<8x1xf32>
    %14 = tpu.iota {dimensions = array<i32: 1>} : vector<8x32xi32>
    %15 = vector.broadcast %4 : vector<8x1xi32> to vector<8x32xi32>
    %16 = arith.cmpi eq, %14, %15 : vector<8x32xi32>
    %cst_5 = arith.constant 0.000000e+00 : f32
    %17 = vector.broadcast %cst_5 : f32 to vector<8x32xf32>
    %18 = arith.select %16, %3, %17 : vector<8x32xi1>, vector<8x32xf32>
    %cst_6 = arith.constant dense<0.000000e+00> : vector<8xf32>
    %19 = vector.multi_reduction <add>, %18, %cst_6 [1] : vector<8x32xf32> to vector<8xf32>
    %20 = vector.shape_cast %19 : vector<8xf32> to vector<8x1xf32>
    %21 = arith.subf %13, %20 : vector<8x1xf32>
    %c0_i32_7 = arith.constant 0 : i32
    %22 = vector.broadcast %c0_i32_7 : i32 to vector<8x1xi32>
    %23 = arith.cmpi sge, %4, %22 : vector<8x1xi32>
    %24 = arith.extui %23 : vector<8x1xi1> to vector<8x1xi32>
    %25 = arith.sitofp %24 : vector<8x1xi32> to vector<8x1xf32>
    %c0_8 = arith.constant 0 : index
    %c0_9 = arith.constant 0 : index
    %26 = vector.load %arg4[%c0_8, %c0_9] : memref<1x1xf32, #tpu.memory_space<vmem>>, vector<1x1xf32>
    %27 = arith.mulf %21, %25 : vector<8x1xf32>
    %cst_10 = arith.constant dense<0.000000e+00> : vector<1xf32>
    %28 = vector.multi_reduction <add>, %27, %cst_10 [0] : vector<8x1xf32> to vector<1xf32>
    %29 = vector.shape_cast %28 : vector<1xf32> to vector<1x1xf32>
    %30 = arith.addf %26, %29 : vector<1x1xf32>
    %c0_11 = arith.constant 0 : index
    %c0_12 = arith.constant 0 : index
    %31 = vector.load %arg4[%c0_11, %c0_12] : memref<1x1xf32, #tpu.memory_space<vmem>>, vector<1x1xf32>
    tpu.vector_store %arg4[%c0_11, %c0_12], %30 {strides = array<i32>} : memref<1x1xf32, #tpu.memory_space<vmem>>, vector<1x1xf32>,
    %c0_i32_13 = arith.constant 0 : i32
    %32 = arith.cmpi eq, %arg0, %c0_i32_13 : i32
    %33 = arith.extui %32 : i1 to i32
    %c0_i32_14 = arith.constant 0 : i32
    %34 = arith.cmpi ne, %33, %c0_i32_14 : i32
    scf.if %34 {
      %c0_15 = arith.constant 0 : index
      %c0_16 = arith.constant 0 : index
      %35 = vector.load %arg4[%c0_15, %c0_16] : memref<1x1xf32, #tpu.memory_space<vmem>>, vector<1x1xf32>
      %cst_17 = arith.constant 8.000000e+00 : f32
      %36 = vector.broadcast %cst_17 : f32 to vector<1x1xf32>
      %37 = arith.divf %35, %36 : vector<1x1xf32>
      %cst_18 = arith.constant 0.000000e+00 : f32
      %38 = vector.broadcast %cst_18 : f32 to vector<1x1xf32>
      %39 = arith.subf %38, %37 : vector<1x1xf32>
      %40 = math.exp %39 : vector<1x1xf32>
      %cst_19 = arith.constant 1.000000e+00 : f32
      %41 = vector.broadcast %cst_19 : f32 to vector<1x1xf32>
      %42 = arith.subf %41, %40 : vector<1x1xf32>
      %43 = arith.mulf %42, %42 : vector<1x1xf32>
      %44 = arith.mulf %43, %37 : vector<1x1xf32>
      %c0_20 = arith.constant 0 : index
      %c0_21 = arith.constant 0 : index
      %45 = vector.load %arg3[%c0_20, %c0_21] : memref<1x1xf32, #tpu.memory_space<vmem>>, vector<1x1xf32>
      tpu.vector_store %arg3[%c0_20, %c0_21], %44 {strides = array<i32>} : memref<1x1xf32, #tpu.memory_space<vmem>>, vector<1x1xf32>,
    } else {
    }
    return
  }
  func.func @transform_0(%arg0: i32) -> (i32, i32) {
    %c0_i32 = arith.constant 0 : i32
    %c0_i32_0 = arith.constant 0 : i32
    return %arg0, %c0_i32 : i32, i32
  }
  func.func @transform_1(%arg0: i32) -> (i32, i32) {
    %c0_i32 = arith.constant 0 : i32
    %c0_i32_0 = arith.constant 0 : i32
    return %arg0, %c0_i32 : i32, i32
  }
  func.func @transform_2(%arg0: i32) -> (i32, i32) {
    %c0_i32 = arith.constant 0 : i32
    %c0_i32_0 = arith.constant 0 : i32
    %c0_i32_1 = arith.constant 0 : i32
    return %c0_i32, %c0_i32_0 : i32, i32
  }
}

</mosaic_0001>

<bundles_post_ra>
// kernel: tpu_custom_call.1
= control target key start
LH: loop header
LB: loop body
LE: loop exit
PB: predicated region body
PF: predicated region fallthrough
CT: control target
= control target key end

     0   :  { %vm20_vm0 = vcmask 261120   ;;  %s153_s0 = inlined_call_operand.vmem [shape: f32[8,32], index: 0, kind: input, shape index: {}]   ;;  %s154_s1 = inlined_call_operand.vmem [shape: s32[8,1], index: 1, kind: input, shape index: {}]   ;;  %s155_s2 = inlined_call_operand.hbm [shape: f32[1,1], index: 2, kind: output, shape index: {}]  }
   0x1   :  { %v18_v0 = vld [vmem:[%s153_s0] sm:$0xff] }
   0x2   :  { %7 = vsyncpa [#allocation4], 0  ;;  %v21_v1 = vsel %vm20_vm0, %v18_v0, -inf  ;;  %v120_v2 = vmov 0   ;;  %v19_v3 = vld [vmem:[%s154_s1] sm:$0xff]  ;;  %v33_v7 = vlaneseq  ;;  %v121_v14 = vmov 0.0  }
   0x3   :  { %91 = vset.pattern.permute.xlu0 %v120_v2  ;;  %vm44_vm2 = vcmp.ge.s32.totalorder %v19_v3, 0  ;;  %vm16_vm3 = vcmask 0   ;;  %vm49_vm4 = vcmask 7168   ;;  %s122_s0 = smov [#allocation3]  }
   0x4   :  { %22 = vmax.xlane.f32.xlu0 %v21_v1  ;;  %v34_v8 = vand.u32 127, %v33_v7  ;;  %v87_v15 = vsel %vm44_vm2, 1.0, %v121_v14  ;;  %17 = vst.msk [vmem:[#allocation2] sm:$0x1] %vm16_vm3, %v121_v14  ;;  %s79_s1 = sshll.u32 %s122_s0, 4  ;;  %s80_s1 = int_to_ptr.vmem [resolvable:$true] %s79_s1 }
   0x5   :  { %s98_s13 = scalar_lea.vmem %s80_s1, 16  ;;  %s102_s14 = scalar_lea.vmem %s80_s1, 32 }
   0x6   :  { %p99_p0 = scmp.ne.s32.totalorder %s80_s1, %s98_s13  ;;  %p103_p1 = scmp.lt.s32.totalorder %s80_s1, %s80_s1 }
   0x7   :  { %p104_p2 = scmp.lt.s32.totalorder %s102_s14, %s98_s13 }
   0x9   :  { %p105_p3 = por %p104_p2, %p103_p1 }
   0xb   :  { %v47_v29 = vld [vmem:[#allocation2] sm:$0x1]  ;;  %p106_p4 = pnand %p105_p3, %p99_p0 }
  0x1a   :  { %36 = vperm.xlu0 %91, %v19_v3  }
  0x8d   :  { %v23_v4 = vpop.xlane.xlu0 %22 }
  0x8e   :  { %v24_v5 = vsub.f32 %v18_v0, %v23_v4 }
  0x90   :  { %v25_v6 = vmul.f32 1.442695, %v24_v5 }
  0x92   :  { %92 = vpow2.f32 %v25_v6 }
  0x95   :  { %v37_v9 = vpop.permute.xlu0 %36 }
  0x96   :  { %vm38_vm1 = vcmp.eq.s32.totalorder %v34_v8, %v37_v9 }
  0x97   :  { %v39_v11 = vsel %vm38_vm1, %v18_v0, 0.0 }
  0x98   :  { %v40_v13 = vsel %vm20_vm0, %v39_v11, 0.0 }
  0x9f   :  { %v93_v10 = vpop.eup %92 }
  0xa0   :  { %v27_v12 = vsel %vm20_vm0, %v93_v10, 0.0 }
  0xa1   :  { %28 = vadd.xlane.f32.xlu1 %v27_v12 }
  0xa5   :  { %41 = vadd.xlane.f32.xlu1 %v40_v13 }
 0x12a   :  { %v29_v16 = vpop.xlane.xlu1 %28 }
 0x12b   :  { %94 = vlog2.f32 %v29_v16 }
 0x12e   :  { %v42_v19 = vpop.xlane.xlu1 %41 }
 0x138   :  { %v95_v17 = vpop.eup %94 }
 0x139   :  { %v31_v18 = vmul.f32 0.6931472, %v95_v17 }
 0x13b   :  { %v32_v20 = vadd.f32 %v31_v18, %v23_v4 }
 0x13d   :  { %v43_v21 = vsub.f32 %v32_v20, %v42_v19 }
 0x13f   :  { %v48_v22 = vmul.f32 %v87_v15, %v43_v21 }
 0x141   :  { %v50_v23 = vsel %vm49_vm4, %v48_v22, 0.0 }
 0x142   :  { %v51_v24 = vrot.slane %v50_v23, 4 }
 0x144   :  { %v52_v25 = vadd.f32 %v51_v24, %v50_v23 }
 0x146   :  { %v53_v26 = vrot.slane %v52_v25, 2 }
 0x148   :  { %v54_v27 = vadd.f32 %v53_v26, %v52_v25 }
 0x14a   :  { %v55_v28 = vrot.slane %v54_v27, 1 }
 0x14c   :  { %v56_v30 = vadd.f32 %v55_v28, %v54_v27 }
 0x14e   :  { %v57_v31 = vadd.f32 %v56_v30, %v47_v29 }
 0x150   :  { %59 = vst.msk [vmem:[#allocation2] sm:$0x1] %vm16_vm3, %v57_v31 }
 0x157   :  { %v63_v32 = vld [vmem:[#allocation2] sm:$0x1] }
 0x158   :  { %v65_v33 = vmul.f32 0.125, %v63_v32 }
 0x15a   :  { %v66_v34 = vsub.f32 0.0, %v65_v33 }
 0x15c   :  { %v67_v35 = vmul.f32 1.442695, %v66_v34 }
 0x15e   :  { %96 = vpow2.f32 %v67_v35 }
 0x16b   :  { %v97_v36 = vpop.eup %96 }
 0x16c   :  { %v69_v37 = vsub.f32 1.0, %v97_v36 }
 0x16e   :  { %v70_v38 = vmul.f32 %v69_v37, %v69_v37 }
 0x170   :  { %v71_v39 = vmul.f32 %v70_v38, %v65_v33 }
 0x172   :  { %72 = vst.msk [vmem:[#allocation3] sm:$0x1] %vm16_vm3, %v71_v39 }
 0x173   :  { %109 = shalt.err (!%p106_p4)
}
 0x174   :  { %82 = dma.vmem_to_hbm [thread:$0]  %s80_s1, 16, %s155_s2, [#allocation4]  }
 0x175   :  { %118 = dma.done.wait [#allocation4], 16  }
 0x176   :  { %119 = vsyncadd [#allocation4], 4294967280 }
 0x177   :  { %86 = vsyncpa [#allocation4], 1 }

</bundles_post_ra>
